<compile_context>
chip_gen: v7x
topology: tpu7x:2x2x1
jax: 0.10.0
libtpu: 0.0.40
codegen_flags: <defaults>
</compile_context>

<pallas_src>
import math

import jax
import jax.numpy as jnp
from jax.experimental import pallas as pl
from jax.experimental.pallas import tpu as pltpu


def _make_fused_kernel(layer_dims, K, F0, T):
    """Fused N-layer kernel, one batch element per grid step.

    layer_dims : tuple of (C_in, C_out) per layer
    K          : conv kernel size (odd)
    F0         : input frequency size
    T          : time size (preserved by every layer, 'same' time padding)
    """
    pad = K // 2

    def kernel(x_ref, *refs):
        o_ref = refs[-1]
        prefs = refs[:-1]  # 2 refs per layer: stacked weights, stacked bias

        # Load the (small) input once as per-frequency rows of shape (C0, T).
        rows = [x_ref[0, :, fi, :].astype(jnp.float32) for fi in range(F0)]
        F_cur = F0
        act = None

        for l, (C_in, C_out) in enumerate(layer_dims):
            Wl = prefs[2 * l][...].astype(jnp.float32)       # (2*C_out, K*K*C_in)
            bl = prefs[2 * l + 1][...].astype(jnp.float32)   # (2*C_out, 1)

            F_out = (F_cur - 1) // 2 + 1
            zero_row = jnp.zeros((C_in, T), jnp.float32)

            # im2col slab, tap-major rows / (freq, time)-major lanes:
            #   P[(dh*K+dw)*C_in + ci, f*T + t] = x_pad[ci, 2f + dh - pad, t + dw - pad]
            tap_blocks = []
            for dh in range(K):
                for dw in range(K):
                    s = dw - pad
                    segs = []
                    for f in range(F_out):
                        fi = 2 * f + dh - pad
                        base = rows[fi] if 0 <= fi < F_cur else zero_row
                        if s == 0:
                            blk = base
                        elif s < 0:   # shift right, zero-fill left (time padding)
                            blk = jnp.concatenate(
                                [jnp.zeros((C_in, -s), jnp.float32),
                                 base[:, : T + s]], axis=1)
                        else:         # shift left, zero-fill right
                            blk = jnp.concatenate(
                                [base[:, s:],
                                 jnp.zeros((C_in, s), jnp.float32)], axis=1)
                        segs.append(blk)
                    tap_blocks.append(
                        jnp.concatenate(segs, axis=1) if F_out > 1 else segs[0])
            P = jnp.concatenate(tap_blocks, axis=0)           # (K*K*C_in, F_out*T)

            # ONE MXU matmul per layer covers both the KxK conv (rows 0:C_out)
            # and the 1x1 strided skip conv (rows C_out:2*C_out; folded into the
            # centre tap of the stacked weights by the wrapper).  f32 accumulation.
            Z = jnp.dot(Wl, P, preferred_element_type=jnp.float32) + bl
            act = jnp.maximum(Z[:C_out, :], 0.0) + Z[C_out:, :]   # relu(conv) + skip

            rows = [act[:, f * T:(f + 1) * T] for f in range(F_out)]
            F_cur = F_out

        # Final activation is already packed lane-dense as (C_final, F_final*T);
        # torch.squeeze(x, 2) is therefore fused into the store.
        o_ref[0, :, :] = act.astype(o_ref.dtype)

    return kernel


def spectrogram_modality(x, params):
    """Forward pass of SpectrogramModality, fused into one pallas_call.

    x      : (B, C0, F, T) float32, NCHW
    params : list of (w, b, ws, bs) per ConvRes layer
             w : (C_out, C_in, K, K), b : (C_out,), ws : (C_out, C_in), bs : (C_out,)
    """
    B, C0, F, T = x.shape
    K = params[0][0].shape[2]
    assert K % 2 == 1, "odd conv kernel expected (same time padding)"
    pad = K // 2

    flat_inputs = [x]
    layer_dims = []
    F_cur = F
    for (w, b, ws, bs) in params:
        C_out, C_in, _, _ = w.shape
        # Flatten conv weights to (C_out, K*K*C_in), tap-major (dh, dw, ci)
        # to match the kernel's im2col row order.
        W2 = jnp.transpose(w, (0, 2, 3, 1)).reshape(C_out, K * K * C_in)
        # Fold the 1x1 skip conv into the centre tap (dh=pad, dw=pad): the
        # skip input x[:, 2f, t] is exactly that tap of the slab (never padded).
        Ws = jnp.zeros((C_out, K * K * C_in), w.dtype)
        ctr = (pad * K + pad) * C_in
        Ws = Ws.at[:, ctr:ctr + C_in].set(ws)
        W_stack = jnp.concatenate([W2, Ws], axis=0)                    # (2*C_out, KKC)
        b_stack = jnp.concatenate([b, bs], axis=0).reshape(2 * C_out, 1)
        flat_inputs += [W_stack, b_stack]
        layer_dims.append((C_in, C_out))
        F_cur = (F_cur - 1) // 2 + 1
    F_final = F_cur
    C_final = layer_dims[-1][1]

    kernel = _make_fused_kernel(tuple(layer_dims), K, F, T)

    in_specs = [pl.BlockSpec((1, C0, F, T), lambda bb: (bb, 0, 0, 0))]
    for (C_in, C_out) in layer_dims:
        in_specs += [
            pl.BlockSpec((2 * C_out, K * K * C_in), lambda bb: (0, 0)),
            pl.BlockSpec((2 * C_out, 1), lambda bb: (0, 0)),
        ]

    out = pl.pallas_call(
        kernel,
        out_shape=jax.ShapeDtypeStruct((B, C_final, F_final * T), x.dtype),
        grid=(B,),
        in_specs=in_specs,
        out_specs=pl.BlockSpec((1, C_final, F_final * T), lambda bb: (bb, 0, 0)),
        compiler_params=pltpu.CompilerParams(dimension_semantics=("parallel",)),
    )(*flat_inputs)

    if F_final == 1:
        return out  # torch.squeeze(x, 2) already fused into the kernel output
    # squeeze(2) is a no-op when the frequency dim is not 1; restore NCHW.
    return out.reshape(B, C_final, F_final, T)


# ----------------------------- pure-JAX reference -----------------------------
def _convres_reference(x, w, b, ws, bs):
    K = w.shape[2]
    pad = K // 2
    conv = jax.lax.conv_general_dilated(
        x, w, window_strides=(2, 1), padding=((pad, pad), (pad, pad)),
        dimension_numbers=("NCHW", "OIHW", "NCHW"))
    conv = jax.nn.relu(conv + b[None, :, None, None])
    skip = jax.lax.conv_general_dilated(
        x, ws[:, :, None, None], window_strides=(2, 1), padding=((0, 0), (0, 0)),
        dimension_numbers=("NCHW", "OIHW", "NCHW"))
    skip = skip + bs[None, :, None, None]
    return conv + skip


def spectrogram_modality_reference(x, params):
    for (w, b, ws, bs) in params:
        x = _convres_reference(x, w, b, ws, bs)
    return jnp.squeeze(x, axis=2)


# ----------------------------------- main -------------------------------------
def init_params(N, kernel_size, key):
    params = []
    for l in range(N):
        cin, cout = 2 ** l, 2 ** (l + 1)
        key, k1, k2, k3, k4 = jax.random.split(key, 5)
        bound = 1.0 / math.sqrt(cin * kernel_size * kernel_size)
        w = jax.random.uniform(k1, (cout, cin, kernel_size, kernel_size),
                               jnp.float32, -bound, bound)
        b = jax.random.uniform(k2, (cout,), jnp.float32, -bound, bound)
        sbound = 1.0 / math.sqrt(cin)
        ws = jax.random.uniform(k3, (cout, cin), jnp.float32, -sbound, sbound)
        bs = jax.random.uniform(k4, (cout,), jnp.float32, -sbound, sbound)
        params.append((w, b, ws, bs))
    return params


if __name__ == "__main__":
    N = 3            # ConvRes layers: channels 1 -> 2 -> 4 -> 8
    kernel_size = 3
    B, T = 2, 16
    F = 2 ** N       # frequency halves each layer, reaching 1 before squeeze

    key = jax.random.PRNGKey(0)
    key, kx = jax.random.split(key)
    x = jax.random.normal(kx, (B, 1, F, T), jnp.float32)   # NCHW
    params = init_params(N, kernel_size, key)

    out = jax.block_until_ready(spectrogram_modality(x, params))
    ref = jax.block_until_ready(spectrogram_modality_reference(x, params))

    assert out.shape == (B, 2 ** N, T), out.shape
    max_err = float(jnp.max(jnp.abs(out - ref)))
    assert max_err < 1e-3, f"mismatch vs reference: {max_err}"

    print("KERNEL_OK")
</pallas_src>

<mosaic_0001>
module attributes {stable_mosaic.version = 11 : i64} {
  func.func @kernel(%arg0: i32, %arg1: memref<1x1x8x16xf32, #tpu.memory_space<vmem>>, %arg2: memref<4x9xf32, #tpu.memory_space<vmem>>, %arg3: memref<4x1xf32, #tpu.memory_space<vmem>>, %arg4: memref<8x18xf32, #tpu.memory_space<vmem>>, %arg5: memref<8x1xf32, #tpu.memory_space<vmem>>, %arg6: memref<16x36xf32, #tpu.memory_space<vmem>>, %arg7: memref<16x1xf32, #tpu.memory_space<vmem>>, %arg8: memref<1x8x16xf32, #tpu.memory_space<vmem>>) attributes {dimension_semantics = [#tpu.dimension_semantics<parallel>], iteration_bounds = array<i64: 2>, scalar_prefetch = 0 : i64, scratch_operands = 0 : i64, tpu.core_type = #tpu.core_type<tc>, window_params = [{transform_indices = @transform_0, window_bounds = array<i64: 1, 1, 8, 16>}, {pipeline_mode = #tpu.pipeline_mode<synchronous>, transform_indices = @transform_1, window_bounds = array<i64: 4, 9>}, {pipeline_mode = #tpu.pipeline_mode<synchronous>, transform_indices = @transform_2, window_bounds = array<i64: 4, 1>}, {pipeline_mode = #tpu.pipeline_mode<synchronous>, transform_indices = @transform_3, window_bounds = array<i64: 8, 18>}, {pipeline_mode = #tpu.pipeline_mode<synchronous>, transform_indices = @transform_4, window_bounds = array<i64: 8, 1>}, {pipeline_mode = #tpu.pipeline_mode<synchronous>, transform_indices = @transform_5, window_bounds = array<i64: 16, 36>}, {pipeline_mode = #tpu.pipeline_mode<synchronous>, transform_indices = @transform_6, window_bounds = array<i64: 16, 1>}, {transform_indices = @transform_7, window_bounds = array<i64: 1, 8, 16>}]} {
    %c0 = arith.constant 0 : index
    %c0_0 = arith.constant 0 : index
    %c0_1 = arith.constant 0 : index
    %c0_2 = arith.constant 0 : index
    %0 = vector.load %arg1[%c0, %c0_0, %c0_1, %c0_2] : memref<1x1x8x16xf32, #tpu.memory_space<vmem>>, vector<1x1x1x16xf32>
    %1 = vector.shape_cast %0 : vector<1x1x1x16xf32> to vector<1x16xf32>
    %c0_3 = arith.constant 0 : index
    %c0_4 = arith.constant 0 : index
    %c1 = arith.constant 1 : index
    %c0_5 = arith.constant 0 : index
    %2 = vector.load %arg1[%c0_3, %c0_4, %c1, %c0_5] : memref<1x1x8x16xf32, #tpu.memory_space<vmem>>, vector<1x1x1x16xf32>
    %3 = vector.shape_cast %2 : vector<1x1x1x16xf32> to vector<1x16xf32>
    %c0_6 = arith.constant 0 : index
    %c0_7 = arith.constant 0 : index
    %c2 = arith.constant 2 : index
    %c0_8 = arith.constant 0 : index
    %4 = vector.load %arg1[%c0_6, %c0_7, %c2, %c0_8] : memref<1x1x8x16xf32, #tpu.memory_space<vmem>>, vector<1x1x1x16xf32>
    %5 = vector.shape_cast %4 : vector<1x1x1x16xf32> to vector<1x16xf32>
    %c0_9 = arith.constant 0 : index
    %c0_10 = arith.constant 0 : index
    %c3 = arith.constant 3 : index
    %c0_11 = arith.constant 0 : index
    %6 = vector.load %arg1[%c0_9, %c0_10, %c3, %c0_11] : memref<1x1x8x16xf32, #tpu.memory_space<vmem>>, vector<1x1x1x16xf32>
    %7 = vector.shape_cast %6 : vector<1x1x1x16xf32> to vector<1x16xf32>
    %c0_12 = arith.constant 0 : index
    %c0_13 = arith.constant 0 : index
    %c4 = arith.constant 4 : index
    %c0_14 = arith.constant 0 : index
    %8 = vector.load %arg1[%c0_12, %c0_13, %c4, %c0_14] : memref<1x1x8x16xf32, #tpu.memory_space<vmem>>, vector<1x1x1x16xf32>
    %9 = vector.shape_cast %8 : vector<1x1x1x16xf32> to vector<1x16xf32>
    %c0_15 = arith.constant 0 : index
    %c0_16 = arith.constant 0 : index
    %c5 = arith.constant 5 : index
    %c0_17 = arith.constant 0 : index
    %10 = vector.load %arg1[%c0_15, %c0_16, %c5, %c0_17] : memref<1x1x8x16xf32, #tpu.memory_space<vmem>>, vector<1x1x1x16xf32>
    %11 = vector.shape_cast %10 : vector<1x1x1x16xf32> to vector<1x16xf32>
    %c0_18 = arith.constant 0 : index
    %c0_19 = arith.constant 0 : index
    %c6 = arith.constant 6 : index
    %c0_20 = arith.constant 0 : index
    %12 = vector.load %arg1[%c0_18, %c0_19, %c6, %c0_20] : memref<1x1x8x16xf32, #tpu.memory_space<vmem>>, vector<1x1x1x16xf32>
    %13 = vector.shape_cast %12 : vector<1x1x1x16xf32> to vector<1x16xf32>
    %c0_21 = arith.constant 0 : index
    %c0_22 = arith.constant 0 : index
    %c7 = arith.constant 7 : index
    %c0_23 = arith.constant 0 : index
    %14 = vector.load %arg1[%c0_21, %c0_22, %c7, %c0_23] : memref<1x1x8x16xf32, #tpu.memory_space<vmem>>, vector<1x1x1x16xf32>
    %15 = vector.shape_cast %14 : vector<1x1x1x16xf32> to vector<1x16xf32>
    %c0_24 = arith.constant 0 : index
    %c0_25 = arith.constant 0 : index
    %16 = vector.load %arg2[%c0_24, %c0_25] : memref<4x9xf32, #tpu.memory_space<vmem>>, vector<4x9xf32>
    %c0_26 = arith.constant 0 : index
    %c0_27 = arith.constant 0 : index
    %17 = vector.load %arg3[%c0_26, %c0_27] : memref<4x1xf32, #tpu.memory_space<vmem>>, vector<4x1xf32>
    %cst = arith.constant 0.000000e+00 : f32
    %18 = vector.broadcast %cst : f32 to vector<1x16xf32>
    %cst_28 = arith.constant 0.000000e+00 : f32
    %19 = vector.broadcast %cst_28 : f32 to vector<1x1xf32>
    %20 = vector.extract_strided_slice %18 {offsets = [0, 0], sizes = [1, 15], strides = [1, 1]} : vector<1x16xf32> to vector<1x15xf32>
    %21 = tpu.concatenate %19, %20 in 1 : vector<1x1xf32>, vector<1x15xf32> -> vector<1x16xf32>
    %cst_29 = arith.constant 0.000000e+00 : f32
    %22 = vector.broadcast %cst_29 : f32 to vector<1x1xf32>
    %23 = vector.extract_strided_slice %3 {offsets = [0, 0], sizes = [1, 15], strides = [1, 1]} : vector<1x16xf32> to vector<1x15xf32>
    %24 = tpu.concatenate %22, %23 in 1 : vector<1x1xf32>, vector<1x15xf32> -> vector<1x16xf32>
    %cst_30 = arith.constant 0.000000e+00 : f32
    %25 = vector.broadcast %cst_30 : f32 to vector<1x1xf32>
    %26 = vector.extract_strided_slice %7 {offsets = [0, 0], sizes = [1, 15], strides = [1, 1]} : vector<1x16xf32> to vector<1x15xf32>
    %27 = tpu.concatenate %25, %26 in 1 : vector<1x1xf32>, vector<1x15xf32> -> vector<1x16xf32>
    %cst_31 = arith.constant 0.000000e+00 : f32
    %28 = vector.broadcast %cst_31 : f32 to vector<1x1xf32>
    %29 = vector.extract_strided_slice %11 {offsets = [0, 0], sizes = [1, 15], strides = [1, 1]} : vector<1x16xf32> to vector<1x15xf32>
    %30 = tpu.concatenate %28, %29 in 1 : vector<1x1xf32>, vector<1x15xf32> -> vector<1x16xf32>
    %31 = tpu.concatenate %21, %24, %27, %30 in 1 : vector<1x16xf32>, vector<1x16xf32>, vector<1x16xf32>, vector<1x16xf32> -> vector<1x64xf32>
    %32 = tpu.concatenate %18, %3, %7, %11 in 1 : vector<1x16xf32>, vector<1x16xf32>, vector<1x16xf32>, vector<1x16xf32> -> vector<1x64xf32>
    %33 = vector.extract_strided_slice %18 {offsets = [0, 1], sizes = [1, 15], strides = [1, 1]} : vector<1x16xf32> to vector<1x15xf32>
    %cst_32 = arith.constant 0.000000e+00 : f32
    %34 = vector.broadcast %cst_32 : f32 to vector<1x1xf32>
    %35 = tpu.concatenate %33, %34 in 1 : vector<1x15xf32>, vector<1x1xf32> -> vector<1x16xf32>
    %36 = vector.extract_strided_slice %3 {offsets = [0, 1], sizes = [1, 15], strides = [1, 1]} : vector<1x16xf32> to vector<1x15xf32>
    %cst_33 = arith.constant 0.000000e+00 : f32
    %37 = vector.broadcast %cst_33 : f32 to vector<1x1xf32>
    %38 = tpu.concatenate %36, %37 in 1 : vector<1x15xf32>, vector<1x1xf32> -> vector<1x16xf32>
    %39 = vector.extract_strided_slice %7 {offsets = [0, 1], sizes = [1, 15], strides = [1, 1]} : vector<1x16xf32> to vector<1x15xf32>
    %cst_34 = arith.constant 0.000000e+00 : f32
    %40 = vector.broadcast %cst_34 : f32 to vector<1x1xf32>
    %41 = tpu.concatenate %39, %40 in 1 : vector<1x15xf32>, vector<1x1xf32> -> vector<1x16xf32>
    %42 = vector.extract_strided_slice %11 {offsets = [0, 1], sizes = [1, 15], strides = [1, 1]} : vector<1x16xf32> to vector<1x15xf32>
    %cst_35 = arith.constant 0.000000e+00 : f32
    %43 = vector.broadcast %cst_35 : f32 to vector<1x1xf32>
    %44 = tpu.concatenate %42, %43 in 1 : vector<1x15xf32>, vector<1x1xf32> -> vector<1x16xf32>
    %45 = tpu.concatenate %35, %38, %41, %44 in 1 : vector<1x16xf32>, vector<1x16xf32>, vector<1x16xf32>, vector<1x16xf32> -> vector<1x64xf32>
    %cst_36 = arith.constant 0.000000e+00 : f32
    %46 = vector.broadcast %cst_36 : f32 to vector<1x1xf32>
    %47 = vector.extract_strided_slice %1 {offsets = [0, 0], sizes = [1, 15], strides = [1, 1]} : vector<1x16xf32> to vector<1x15xf32>
    %48 = tpu.concatenate %46, %47 in 1 : vector<1x1xf32>, vector<1x15xf32> -> vector<1x16xf32>
    %cst_37 = arith.constant 0.000000e+00 : f32
    %49 = vector.broadcast %cst_37 : f32 to vector<1x1xf32>
    %50 = vector.extract_strided_slice %5 {offsets = [0, 0], sizes = [1, 15], strides = [1, 1]} : vector<1x16xf32> to vector<1x15xf32>
    %51 = tpu.concatenate %49, %50 in 1 : vector<1x1xf32>, vector<1x15xf32> -> vector<1x16xf32>
    %cst_38 = arith.constant 0.000000e+00 : f32
    %52 = vector.broadcast %cst_38 : f32 to vector<1x1xf32>
    %53 = vector.extract_strided_slice %9 {offsets = [0, 0], sizes = [1, 15], strides = [1, 1]} : vector<1x16xf32> to vector<1x15xf32>
    %54 = tpu.concatenate %52, %53 in 1 : vector<1x1xf32>, vector<1x15xf32> -> vector<1x16xf32>
    %cst_39 = arith.constant 0.000000e+00 : f32
    %55 = vector.broadcast %cst_39 : f32 to vector<1x1xf32>
    %56 = vector.extract_strided_slice %13 {offsets = [0, 0], sizes = [1, 15], strides = [1, 1]} : vector<1x16xf32> to vector<1x15xf32>
    %57 = tpu.concatenate %55, %56 in 1 : vector<1x1xf32>, vector<1x15xf32> -> vector<1x16xf32>
    %58 = tpu.concatenate %48, %51, %54, %57 in 1 : vector<1x16xf32>, vector<1x16xf32>, vector<1x16xf32>, vector<1x16xf32> -> vector<1x64xf32>
    %59 = tpu.concatenate %1, %5, %9, %13 in 1 : vector<1x16xf32>, vector<1x16xf32>, vector<1x16xf32>, vector<1x16xf32> -> vector<1x64xf32>
    %60 = vector.extract_strided_slice %1 {offsets = [0, 1], sizes = [1, 15], strides = [1, 1]} : vector<1x16xf32> to vector<1x15xf32>
    %cst_40 = arith.constant 0.000000e+00 : f32
    %61 = vector.broadcast %cst_40 : f32 to vector<1x1xf32>
    %62 = tpu.concatenate %60, %61 in 1 : vector<1x15xf32>, vector<1x1xf32> -> vector<1x16xf32>
    %63 = vector.extract_strided_slice %5 {offsets = [0, 1], sizes = [1, 15], strides = [1, 1]} : vector<1x16xf32> to vector<1x15xf32>
    %cst_41 = arith.constant 0.000000e+00 : f32
    %64 = vector.broadcast %cst_41 : f32 to vector<1x1xf32>
    %65 = tpu.concatenate %63, %64 in 1 : vector<1x15xf32>, vector<1x1xf32> -> vector<1x16xf32>
    %66 = vector.extract_strided_slice %9 {offsets = [0, 1], sizes = [1, 15], strides = [1, 1]} : vector<1x16xf32> to vector<1x15xf32>
    %cst_42 = arith.constant 0.000000e+00 : f32
    %67 = vector.broadcast %cst_42 : f32 to vector<1x1xf32>
    %68 = tpu.concatenate %66, %67 in 1 : vector<1x15xf32>, vector<1x1xf32> -> vector<1x16xf32>
    %69 = vector.extract_strided_slice %13 {offsets = [0, 1], sizes = [1, 15], strides = [1, 1]} : vector<1x16xf32> to vector<1x15xf32>
    %cst_43 = arith.constant 0.000000e+00 : f32
    %70 = vector.broadcast %cst_43 : f32 to vector<1x1xf32>
    %71 = tpu.concatenate %69, %70 in 1 : vector<1x15xf32>, vector<1x1xf32> -> vector<1x16xf32>
    %72 = tpu.concatenate %62, %65, %68, %71 in 1 : vector<1x16xf32>, vector<1x16xf32>, vector<1x16xf32>, vector<1x16xf32> -> vector<1x64xf32>
    %cst_44 = arith.constant 0.000000e+00 : f32
    %73 = vector.broadcast %cst_44 : f32 to vector<1x1xf32>
    %74 = vector.extract_strided_slice %3 {offsets = [0, 0], sizes = [1, 15], strides = [1, 1]} : vector<1x16xf32> to vector<1x15xf32>
    %75 = tpu.concatenate %73, %74 in 1 : vector<1x1xf32>, vector<1x15xf32> -> vector<1x16xf32>
    %cst_45 = arith.constant 0.000000e+00 : f32
    %76 = vector.broadcast %cst_45 : f32 to vector<1x1xf32>
    %77 = vector.extract_strided_slice %7 {offsets = [0, 0], sizes = [1, 15], strides = [1, 1]} : vector<1x16xf32> to vector<1x15xf32>
    %78 = tpu.concatenate %76, %77 in 1 : vector<1x1xf32>, vector<1x15xf32> -> vector<1x16xf32>
    %cst_46 = arith.constant 0.000000e+00 : f32
    %79 = vector.broadcast %cst_46 : f32 to vector<1x1xf32>
    %80 = vector.extract_strided_slice %11 {offsets = [0, 0], sizes = [1, 15], strides = [1, 1]} : vector<1x16xf32> to vector<1x15xf32>
    %81 = tpu.concatenate %79, %80 in 1 : vector<1x1xf32>, vector<1x15xf32> -> vector<1x16xf32>
    %cst_47 = arith.constant 0.000000e+00 : f32
    %82 = vector.broadcast %cst_47 : f32 to vector<1x1xf32>
    %83 = vector.extract_strided_slice %15 {offsets = [0, 0], sizes = [1, 15], strides = [1, 1]} : vector<1x16xf32> to vector<1x15xf32>
    %84 = tpu.concatenate %82, %83 in 1 : vector<1x1xf32>, vector<1x15xf32> -> vector<1x16xf32>
    %85 = tpu.concatenate %75, %78, %81, %84 in 1 : vector<1x16xf32>, vector<1x16xf32>, vector<1x16xf32>, vector<1x16xf32> -> vector<1x64xf32>
    %86 = tpu.concatenate %3, %7, %11, %15 in 1 : vector<1x16xf32>, vector<1x16xf32>, vector<1x16xf32>, vector<1x16xf32> -> vector<1x64xf32>
    %87 = vector.extract_strided_slice %3 {offsets = [0, 1], sizes = [1, 15], strides = [1, 1]} : vector<1x16xf32> to vector<1x15xf32>
    %cst_48 = arith.constant 0.000000e+00 : f32
    %88 = vector.broadcast %cst_48 : f32 to vector<1x1xf32>
    %89 = tpu.concatenate %87, %88 in 1 : vector<1x15xf32>, vector<1x1xf32> -> vector<1x16xf32>
    %90 = vector.extract_strided_slice %7 {offsets = [0, 1], sizes = [1, 15], strides = [1, 1]} : vector<1x16xf32> to vector<1x15xf32>
    %cst_49 = arith.constant 0.000000e+00 : f32
    %91 = vector.broadcast %cst_49 : f32 to vector<1x1xf32>
    %92 = tpu.concatenate %90, %91 in 1 : vector<1x15xf32>, vector<1x1xf32> -> vector<1x16xf32>
    %93 = vector.extract_strided_slice %11 {offsets = [0, 1], sizes = [1, 15], strides = [1, 1]} : vector<1x16xf32> to vector<1x15xf32>
    %cst_50 = arith.constant 0.000000e+00 : f32
    %94 = vector.broadcast %cst_50 : f32 to vector<1x1xf32>
    %95 = tpu.concatenate %93, %94 in 1 : vector<1x15xf32>, vector<1x1xf32> -> vector<1x16xf32>
    %96 = vector.extract_strided_slice %15 {offsets = [0, 1], sizes = [1, 15], strides = [1, 1]} : vector<1x16xf32> to vector<1x15xf32>
    %cst_51 = arith.constant 0.000000e+00 : f32
    %97 = vector.broadcast %cst_51 : f32 to vector<1x1xf32>
    %98 = tpu.concatenate %96, %97 in 1 : vector<1x15xf32>, vector<1x1xf32> -> vector<1x16xf32>
    %99 = tpu.concatenate %89, %92, %95, %98 in 1 : vector<1x16xf32>, vector<1x16xf32>, vector<1x16xf32>, vector<1x16xf32> -> vector<1x64xf32>
    %100 = tpu.concatenate %31, %32, %45, %58, %59, %72, %85, %86, %99 in 0 : vector<1x64xf32>, vector<1x64xf32>, vector<1x64xf32>, vector<1x64xf32>, vector<1x64xf32>, vector<1x64xf32>, vector<1x64xf32>, vector<1x64xf32>, vector<1x64xf32> -> vector<9x64xf32>
    %cst_52 = arith.constant dense<0.000000e+00> : vector<4x64xf32>
    %101 = tpu.matmul %16, %100, %cst_52 {dimension_numbers = #tpu.dot_dimension_numbers<[1], [0], [0], [1], [0, 0, 1, 1], [], []>} : vector<4x9xf32>, vector<9x64xf32>, vector<4x64xf32> -> vector<4x64xf32>
    %102 = vector.broadcast %17 : vector<4x1xf32> to vector<4x64xf32>
    %103 = arith.addf %101, %102 : vector<4x64xf32>
    %104 = vector.extract_strided_slice %103 {offsets = [0, 0], sizes = [2, 64], strides = [1, 1]} : vector<4x64xf32> to vector<2x64xf32>
    %cst_53 = arith.constant 0.000000e+00 : f32
    %105 = vector.broadcast %cst_53 : f32 to vector<2x64xf32>
    %106 = arith.maximumf %104, %105 : vector<2x64xf32>
    %107 = vector.extract_strided_slice %103 {offsets = [2, 0], sizes = [2, 64], strides = [1, 1]} : vector<4x64xf32> to vector<2x64xf32>
    %108 = arith.addf %106, %107 : vector<2x64xf32>
    %109 = vector.extract_strided_slice %108 {offsets = [0, 0], sizes = [2, 16], strides = [1, 1]} : vector<2x64xf32> to vector<2x16xf32>
    %110 = vector.extract_strided_slice %108 {offsets = [0, 16], sizes = [2, 16], strides = [1, 1]} : vector<2x64xf32> to vector<2x16xf32>
    %111 = vector.extract_strided_slice %108 {offsets = [0, 32], sizes = [2, 16], strides = [1, 1]} : vector<2x64xf32> to vector<2x16xf32>
    %112 = vector.extract_strided_slice %108 {offsets = [0, 48], sizes = [2, 16], strides = [1, 1]} : vector<2x64xf32> to vector<2x16xf32>
    %c0_54 = arith.constant 0 : index
    %c0_55 = arith.constant 0 : index
    %113 = vector.load %arg4[%c0_54, %c0_55] : memref<8x18xf32, #tpu.memory_space<vmem>>, vector<8x18xf32>
    %c0_56 = arith.constant 0 : index
    %c0_57 = arith.constant 0 : index
    %114 = vector.load %arg5[%c0_56, %c0_57] : memref<8x1xf32, #tpu.memory_space<vmem>>, vector<8x1xf32>
    %cst_58 = arith.constant 0.000000e+00 : f32
    %115 = vector.broadcast %cst_58 : f32 to vector<2x16xf32>
    %cst_59 = arith.constant 0.000000e+00 : f32
    %116 = vector.broadcast %cst_59 : f32 to vector<2x1xf32>
    %117 = vector.extract_strided_slice %115 {offsets = [0, 0], sizes = [2, 15], strides = [1, 1]} : vector<2x16xf32> to vector<2x15xf32>
    %118 = tpu.concatenate %116, %117 in 1 : vector<2x1xf32>, vector<2x15xf32> -> vector<2x16xf32>
    %cst_60 = arith.constant 0.000000e+00 : f32
    %119 = vector.broadcast %cst_60 : f32 to vector<2x1xf32>
    %120 = vector.extract_strided_slice %110 {offsets = [0, 0], sizes = [2, 15], strides = [1, 1]} : vector<2x16xf32> to vector<2x15xf32>
    %121 = tpu.concatenate %119, %120 in 1 : vector<2x1xf32>, vector<2x15xf32> -> vector<2x16xf32>
    %122 = tpu.concatenate %118, %121 in 1 : vector<2x16xf32>, vector<2x16xf32> -> vector<2x32xf32>
    %123 = tpu.concatenate %115, %110 in 1 : vector<2x16xf32>, vector<2x16xf32> -> vector<2x32xf32>
    %124 = vector.extract_strided_slice %115 {offsets = [0, 1], sizes = [2, 15], strides = [1, 1]} : vector<2x16xf32> to vector<2x15xf32>
    %cst_61 = arith.constant 0.000000e+00 : f32
    %125 = vector.broadcast %cst_61 : f32 to vector<2x1xf32>
    %126 = tpu.concatenate %124, %125 in 1 : vector<2x15xf32>, vector<2x1xf32> -> vector<2x16xf32>
    %127 = vector.extract_strided_slice %110 {offsets = [0, 1], sizes = [2, 15], strides = [1, 1]} : vector<2x16xf32> to vector<2x15xf32>
    %cst_62 = arith.constant 0.000000e+00 : f32
    %128 = vector.broadcast %cst_62 : f32 to vector<2x1xf32>
    %129 = tpu.concatenate %127, %128 in 1 : vector<2x15xf32>, vector<2x1xf32> -> vector<2x16xf32>
    %130 = tpu.concatenate %126, %129 in 1 : vector<2x16xf32>, vector<2x16xf32> -> vector<2x32xf32>
    %cst_63 = arith.constant 0.000000e+00 : f32
    %131 = vector.broadcast %cst_63 : f32 to vector<2x1xf32>
    %132 = vector.extract_strided_slice %109 {offsets = [0, 0], sizes = [2, 15], strides = [1, 1]} : vector<2x16xf32> to vector<2x15xf32>
    %133 = tpu.concatenate %131, %132 in 1 : vector<2x1xf32>, vector<2x15xf32> -> vector<2x16xf32>
    %cst_64 = arith.constant 0.000000e+00 : f32
    %134 = vector.broadcast %cst_64 : f32 to vector<2x1xf32>
    %135 = vector.extract_strided_slice %111 {offsets = [0, 0], sizes = [2, 15], strides = [1, 1]} : vector<2x16xf32> to vector<2x15xf32>
    %136 = tpu.concatenate %134, %135 in 1 : vector<2x1xf32>, vector<2x15xf32> -> vector<2x16xf32>
    %137 = tpu.concatenate %133, %136 in 1 : vector<2x16xf32>, vector<2x16xf32> -> vector<2x32xf32>
    %138 = tpu.concatenate %109, %111 in 1 : vector<2x16xf32>, vector<2x16xf32> -> vector<2x32xf32>
    %139 = vector.extract_strided_slice %109 {offsets = [0, 1], sizes = [2, 15], strides = [1, 1]} : vector<2x16xf32> to vector<2x15xf32>
    %cst_65 = arith.constant 0.000000e+00 : f32
    %140 = vector.broadcast %cst_65 : f32 to vector<2x1xf32>
    %141 = tpu.concatenate %139, %140 in 1 : vector<2x15xf32>, vector<2x1xf32> -> vector<2x16xf32>
    %142 = vector.extract_strided_slice %111 {offsets = [0, 1], sizes = [2, 15], strides = [1, 1]} : vector<2x16xf32> to vector<2x15xf32>
    %cst_66 = arith.constant 0.000000e+00 : f32
    %143 = vector.broadcast %cst_66 : f32 to vector<2x1xf32>
    %144 = tpu.concatenate %142, %143 in 1 : vector<2x15xf32>, vector<2x1xf32> -> vector<2x16xf32>
    %145 = tpu.concatenate %141, %144 in 1 : vector<2x16xf32>, vector<2x16xf32> -> vector<2x32xf32>
    %cst_67 = arith.constant 0.000000e+00 : f32
    %146 = vector.broadcast %cst_67 : f32 to vector<2x1xf32>
    %147 = vector.extract_strided_slice %110 {offsets = [0, 0], sizes = [2, 15], strides = [1, 1]} : vector<2x16xf32> to vector<2x15xf32>
    %148 = tpu.concatenate %146, %147 in 1 : vector<2x1xf32>, vector<2x15xf32> -> vector<2x16xf32>
    %cst_68 = arith.constant 0.000000e+00 : f32
    %149 = vector.broadcast %cst_68 : f32 to vector<2x1xf32>
    %150 = vector.extract_strided_slice %112 {offsets = [0, 0], sizes = [2, 15], strides = [1, 1]} : vector<2x16xf32> to vector<2x15xf32>
    %151 = tpu.concatenate %149, %150 in 1 : vector<2x1xf32>, vector<2x15xf32> -> vector<2x16xf32>
    %152 = tpu.concatenate %148, %151 in 1 : vector<2x16xf32>, vector<2x16xf32> -> vector<2x32xf32>
    %153 = tpu.concatenate %110, %112 in 1 : vector<2x16xf32>, vector<2x16xf32> -> vector<2x32xf32>
    %154 = vector.extract_strided_slice %110 {offsets = [0, 1], sizes = [2, 15], strides = [1, 1]} : vector<2x16xf32> to vector<2x15xf32>
    %cst_69 = arith.constant 0.000000e+00 : f32
    %155 = vector.broadcast %cst_69 : f32 to vector<2x1xf32>
    %156 = tpu.concatenate %154, %155 in 1 : vector<2x15xf32>, vector<2x1xf32> -> vector<2x16xf32>
    %157 = vector.extract_strided_slice %112 {offsets = [0, 1], sizes = [2, 15], strides = [1, 1]} : vector<2x16xf32> to vector<2x15xf32>
    %cst_70 = arith.constant 0.000000e+00 : f32
    %158 = vector.broadcast %cst_70 : f32 to vector<2x1xf32>
    %159 = tpu.concatenate %157, %158 in 1 : vector<2x15xf32>, vector<2x1xf32> -> vector<2x16xf32>
    %160 = tpu.concatenate %156, %159 in 1 : vector<2x16xf32>, vector<2x16xf32> -> vector<2x32xf32>
    %161 = tpu.concatenate %122, %123, %130, %137, %138, %145, %152, %153, %160 in 0 : vector<2x32xf32>, vector<2x32xf32>, vector<2x32xf32>, vector<2x32xf32>, vector<2x32xf32>, vector<2x32xf32>, vector<2x32xf32>, vector<2x32xf32>, vector<2x32xf32> -> vector<18x32xf32>
    %cst_71 = arith.constant dense<0.000000e+00> : vector<8x32xf32>
    %162 = tpu.matmul %113, %161, %cst_71 {dimension_numbers = #tpu.dot_dimension_numbers<[1], [0], [0], [1], [0, 0, 1, 1], [], []>} : vector<8x18xf32>, vector<18x32xf32>, vector<8x32xf32> -> vector<8x32xf32>
    %163 = vector.broadcast %114 : vector<8x1xf32> to vector<8x32xf32>
    %164 = arith.addf %162, %163 : vector<8x32xf32>
    %165 = vector.extract_strided_slice %164 {offsets = [0, 0], sizes = [4, 32], strides = [1, 1]} : vector<8x32xf32> to vector<4x32xf32>
    %cst_72 = arith.constant 0.000000e+00 : f32
    %166 = vector.broadcast %cst_72 : f32 to vector<4x32xf32>
    %167 = arith.maximumf %165, %166 : vector<4x32xf32>
    %168 = vector.extract_strided_slice %164 {offsets = [4, 0], sizes = [4, 32], strides = [1, 1]} : vector<8x32xf32> to vector<4x32xf32>
    %169 = arith.addf %167, %168 : vector<4x32xf32>
    %170 = vector.extract_strided_slice %169 {offsets = [0, 0], sizes = [4, 16], strides = [1, 1]} : vector<4x32xf32> to vector<4x16xf32>
    %171 = vector.extract_strided_slice %169 {offsets = [0, 16], sizes = [4, 16], strides = [1, 1]} : vector<4x32xf32> to vector<4x16xf32>
    %c0_73 = arith.constant 0 : index
    %c0_74 = arith.constant 0 : index
    %172 = vector.load %arg6[%c0_73, %c0_74] : memref<16x36xf32, #tpu.memory_space<vmem>>, vector<16x36xf32>
    %c0_75 = arith.constant 0 : index
    %c0_76 = arith.constant 0 : index
    %173 = vector.load %arg7[%c0_75, %c0_76] : memref<16x1xf32, #tpu.memory_space<vmem>>, vector<16x1xf32>
    %cst_77 = arith.constant 0.000000e+00 : f32
    %174 = vector.broadcast %cst_77 : f32 to vector<4x16xf32>
    %cst_78 = arith.constant 0.000000e+00 : f32
    %175 = vector.broadcast %cst_78 : f32 to vector<4x1xf32>
    %176 = vector.extract_strided_slice %174 {offsets = [0, 0], sizes = [4, 15], strides = [1, 1]} : vector<4x16xf32> to vector<4x15xf32>
    %177 = tpu.concatenate %175, %176 in 1 : vector<4x1xf32>, vector<4x15xf32> -> vector<4x16xf32>
    %178 = vector.extract_strided_slice %174 {offsets = [0, 1], sizes = [4, 15], strides = [1, 1]} : vector<4x16xf32> to vector<4x15xf32>
    %cst_79 = arith.constant 0.000000e+00 : f32
    %179 = vector.broadcast %cst_79 : f32 to vector<4x1xf32>
    %180 = tpu.concatenate %178, %179 in 1 : vector<4x15xf32>, vector<4x1xf32> -> vector<4x16xf32>
    %cst_80 = arith.constant 0.000000e+00 : f32
    %181 = vector.broadcast %cst_80 : f32 to vector<4x1xf32>
    %182 = vector.extract_strided_slice %170 {offsets = [0, 0], sizes = [4, 15], strides = [1, 1]} : vector<4x16xf32> to vector<4x15xf32>
    %183 = tpu.concatenate %181, %182 in 1 : vector<4x1xf32>, vector<4x15xf32> -> vector<4x16xf32>
    %184 = vector.extract_strided_slice %170 {offsets = [0, 1], sizes = [4, 15], strides = [1, 1]} : vector<4x16xf32> to vector<4x15xf32>
    %cst_81 = arith.constant 0.000000e+00 : f32
    %185 = vector.broadcast %cst_81 : f32 to vector<4x1xf32>
    %186 = tpu.concatenate %184, %185 in 1 : vector<4x15xf32>, vector<4x1xf32> -> vector<4x16xf32>
    %cst_82 = arith.constant 0.000000e+00 : f32
    %187 = vector.broadcast %cst_82 : f32 to vector<4x1xf32>
    %188 = vector.extract_strided_slice %171 {offsets = [0, 0], sizes = [4, 15], strides = [1, 1]} : vector<4x16xf32> to vector<4x15xf32>
    %189 = tpu.concatenate %187, %188 in 1 : vector<4x1xf32>, vector<4x15xf32> -> vector<4x16xf32>
    %190 = vector.extract_strided_slice %171 {offsets = [0, 1], sizes = [4, 15], strides = [1, 1]} : vector<4x16xf32> to vector<4x15xf32>
    %cst_83 = arith.constant 0.000000e+00 : f32
    %191 = vector.broadcast %cst_83 : f32 to vector<4x1xf32>
    %192 = tpu.concatenate %190, %191 in 1 : vector<4x15xf32>, vector<4x1xf32> -> vector<4x16xf32>
    %193 = tpu.concatenate %177, %174, %180, %183, %170, %186, %189, %171, %192 in 0 : vector<4x16xf32>, vector<4x16xf32>, vector<4x16xf32>, vector<4x16xf32>, vector<4x16xf32>, vector<4x16xf32>, vector<4x16xf32>, vector<4x16xf32>, vector<4x16xf32> -> vector<36x16xf32>
    %cst_84 = arith.constant dense<0.000000e+00> : vector<16x16xf32>
    %194 = tpu.matmul %172, %193, %cst_84 {dimension_numbers = #tpu.dot_dimension_numbers<[1], [0], [0], [1], [0, 0, 1, 1], [], []>} : vector<16x36xf32>, vector<36x16xf32>, vector<16x16xf32> -> vector<16x16xf32>
    %195 = vector.broadcast %173 : vector<16x1xf32> to vector<16x16xf32>
    %196 = arith.addf %194, %195 : vector<16x16xf32>
    %197 = vector.extract_strided_slice %196 {offsets = [0, 0], sizes = [8, 16], strides = [1, 1]} : vector<16x16xf32> to vector<8x16xf32>
    %cst_85 = arith.constant 0.000000e+00 : f32
    %198 = vector.broadcast %cst_85 : f32 to vector<8x16xf32>
    %199 = arith.maximumf %197, %198 : vector<8x16xf32>
    %200 = vector.extract_strided_slice %196 {offsets = [8, 0], sizes = [8, 16], strides = [1, 1]} : vector<16x16xf32> to vector<8x16xf32>
    %201 = arith.addf %199, %200 : vector<8x16xf32>
    %c0_86 = arith.constant 0 : index
    %c0_87 = arith.constant 0 : index
    %c0_88 = arith.constant 0 : index
    %202 = vector.load %arg8[%c0_86, %c0_87, %c0_88] : memref<1x8x16xf32, #tpu.memory_space<vmem>>, vector<1x8x16xf32>
    %203 = vector.shape_cast %202 : vector<1x8x16xf32> to vector<8x16xf32>
    %204 = vector.shape_cast %201 : vector<8x16xf32> to vector<1x8x16xf32>
    tpu.vector_store %arg8[%c0_86, %c0_87, %c0_88], %204 {strides = array<i32>} : memref<1x8x16xf32, #tpu.memory_space<vmem>>, vector<1x8x16xf32>,
    return
  }
  func.func @transform_0(%arg0: i32) -> (i32, i32, i32, i32) {
    %c0_i32 = arith.constant 0 : i32
    %c0_i32_0 = arith.constant 0 : i32
    %c0_i32_1 = arith.constant 0 : i32
    %c0_i32_2 = arith.constant 0 : i32
    return %arg0, %c0_i32, %c0_i32_0, %c0_i32_1 : i32, i32, i32, i32
  }
  func.func @transform_1(%arg0: i32) -> (i32, i32) {
    %c0_i32 = arith.constant 0 : i32
    %c0_i32_0 = arith.constant 0 : i32
    %c0_i32_1 = arith.constant 0 : i32
    return %c0_i32, %c0_i32_0 : i32, i32
  }
  func.func @transform_2(%arg0: i32) -> (i32, i32) {
    %c0_i32 = arith.constant 0 : i32
    %c0_i32_0 = arith.constant 0 : i32
    %c0_i32_1 = arith.constant 0 : i32
    return %c0_i32, %c0_i32_0 : i32, i32
  }
  func.func @transform_3(%arg0: i32) -> (i32, i32) {
    %c0_i32 = arith.constant 0 : i32
    %c0_i32_0 = arith.constant 0 : i32
    %c0_i32_1 = arith.constant 0 : i32
    return %c0_i32, %c0_i32_0 : i32, i32
  }
  func.func @transform_4(%arg0: i32) -> (i32, i32) {
    %c0_i32 = arith.constant 0 : i32
    %c0_i32_0 = arith.constant 0 : i32
    %c0_i32_1 = arith.constant 0 : i32
    return %c0_i32, %c0_i32_0 : i32, i32
  }
  func.func @transform_5(%arg0: i32) -> (i32, i32) {
    %c0_i32 = arith.constant 0 : i32
    %c0_i32_0 = arith.constant 0 : i32
    %c0_i32_1 = arith.constant 0 : i32
    return %c0_i32, %c0_i32_0 : i32, i32
  }
  func.func @transform_6(%arg0: i32) -> (i32, i32) {
    %c0_i32 = arith.constant 0 : i32
    %c0_i32_0 = arith.constant 0 : i32
    %c0_i32_1 = arith.constant 0 : i32
    return %c0_i32, %c0_i32_0 : i32, i32
  }
  func.func @transform_7(%arg0: i32) -> (i32, i32, i32) {
    %c0_i32 = arith.constant 0 : i32
    %c0_i32_0 = arith.constant 0 : i32
    %c0_i32_1 = arith.constant 0 : i32
    return %arg0, %c0_i32, %c0_i32_0 : i32, i32, i32
  }
}

</mosaic_0001>

<bundles_post_ra>
// kernel: tpu_custom_call.1
= control target key start
LH: loop header
LB: loop body
LE: loop exit
PB: predicated region body
PF: predicated region fallthrough
CT: control target
= control target key end

     0   :  { %12 = vsyncpa [#allocation3], 0  ;;  %s1785_s0 = inlined_call_operand.vmem [shape: f32[2,1,8,16], index: 0, kind: input, shape index: {}]   ;;  %s1786_s1 = inlined_call_operand.hbm [shape: f32[4,9], index: 1, kind: input, shape index: {}]   ;;  %s1787_s2 = inlined_call_operand.vmem [shape: f32[4,1], index: 2, kind: input, shape index: {}]   ;;  %s1788_s3 = inlined_call_operand.vmem [shape: f32[8,18], index: 3, kind: input, shape index: {}]   ;;  %s1789_s4 = inlined_call_operand.vmem [shape: f32[8,1], index: 4, kind: input, shape index: {}]   ;;  %s1790_s5 = inlined_call_operand.vmem [shape: f32[16,36], index: 5, kind: input, shape index: {}]   ;;  %s1791_s6 = inlined_call_operand.vmem [shape: f32[16,1], index: 6, kind: input, shape index: {}]   ;;  %s1792_s7 = inlined_call_operand.hbm [shape: f32[2,8,16], index: 7, kind: output, shape index: {}]  }
   0x1   :  { %13 = vsyncpa [#allocation4], 0 }
   0x2   :  { %15 = vsyncpa [#allocation4 + $0x1], 0  ;;  %s1427_s24 = smov 0   ;;  %s1429_s25 = smov 0  }
   0x3   :  { %s1431_s26 = smov 0   ;;  %s1433_s27 = smov 0  }
   0x4 LB: > { %s1448_s28 = sadd.s32 4294967295, %s1365_s27   ;;  %s1020_s29 = sadd.s32 4294967294, %s1365_s27   ;;  %s1365_s27 = sphi %s1433_s27, %s1808_s27   ;;  %s1361_s26 = sphi %s1431_s26, %s1807_s26   ;;  %s1357_s25 = sphi %s1429_s25, %s1806_s25   ;;  %s1353_s24 = sphi %s1427_s24, %s1805_s24  }
   0x5   : > { %s1452_s30 = sadd.s32 1, %s1365_s27   ;;  %s180_s8 = sadd.s32 1, %s1361_s26 }
   0x6   : > { %s177_s9 = ssub.s32 %s1365_s27, %s1452_s30  ;;  %p190_p0 = scmp.ne.s32.totalorder %s1361_s26, %s1357_s25 }
   0x7   : > { %p178_p1 = scmp.eq.s32.totalorder %s177_s9, 0  ;;  %p191_p2 = scmp.eq.s32.totalorder %s1448_s28, 1 }
   0x8   : > { %p196_p3 = scmp.ne.s32.totalorder %s1357_s25, %s1353_s24  ;;  %p197_p4 = scmp.eq.s32.totalorder %s1020_s29, 1 }
   0x9   : > { %s1463_s10 = scalar_select %p178_p1, %s1361_s26, %s180_s8  }
   0xa   : > { %p1465_p5 = por %p191_p2, %p190_p0  ;;  %p1469_p6 = por %p197_p4, %p196_p3 }
   0xb   : > { %p1021_p7 = scmp.ge.s32.totalorder %s1365_s27, 1  ;;  %p204_p8 = scmp.lt.s32.totalorder %s1365_s27, 3 }
   0xc   : > { %s1796_s11 = scalar_select %p1465_p5, 1, 0 }
   0xd   : > { %s1797_s12 = scalar_select %p1469_p6, 1, 0 }
   0xe   : > { %p1793_p9 = scmp.eq.s32.totalorder %s1448_s28, 0  ;;  %p1476_p10 = pnand %p1021_p7, %p204_p8 }
   0xf   : > { %s1367_s14 = smov [#allocation2]   ;;  %s1271_s19 = scalar_lea.hbm %s1786_s1, 64 }
  0x10   : > { %s1798_s13 = scalar_select %p1476_p10, 1, 0 }
  0x11   : > { %s217_s15 = sshll.u32 %s1367_s14, 4  ;;  %p1107_p11 = pneg %p1476_p10  ;;  %s218_s15 = int_to_ptr.vmem [resolvable:$true] %s217_s15 }
  0x12   : > { %p1272_p13 = scmp.ne.s32.totalorder %s1786_s1, %s1271_s19  ;;  %p1278_p3 = scmp.lt.u32.totalorder %s1271_s19, %s1786_s1 }
  0x13   : > { %p1484_p12 = pnand %p1793_p9, %p1107_p11 }
  0x15   : > { %p1273_p0 = pneg %p1484_p12 }
  0x17   : > { %p1274_p1 = pnand %p1273_p0, %p1272_p13 }
  0x19   : > { %p1275_p2 = pneg %p1274_p1 }
  0x1b   : > { %p1280_p4 = pnand %p1278_p3, %p1275_p2 }
  0x1d   : > { %1283 = shalt.err (!%p1280_p4)
}
  0x1e   : > { %s1284_s29 = scalar_lea.vmem %s218_s15, 64  ;;  %p1292_p9 = scmp.lt.s32.totalorder %s218_s15, %s218_s15 }
  0x1f   : > { %p1285_p7 = scmp.ne.s32.totalorder %s218_s15, %s1284_s29  ;;  %p1293_p6 = scmp.lt.s32.totalorder %s1284_s29, %s1284_s29 }
  0x21   : > { %p1287_p8 = pnand %p1285_p7, %p1273_p0  ;;  %p1294_p5 = por %p1293_p6, %p1292_p9 }
  0x23   : > { %p1288_p11 = pneg %p1287_p8 }
  0x25   : > { %p1295_p10 = pnand %p1294_p5, %p1288_p11 }
  0x27   : > { %1298 = shalt.err (!%p1295_p10)
}
  0x28   : > { %1110 = dma.hbm_to_vmem [thread:$0]  (!%p1484_p12), %s1786_s1, 64, %s218_s15, [#allocation3]  }
  0x29   : > { %p1800_p13 = scmp.ne.s32.totalorder %s1798_s13, 0 }
  0x2a   : > { %p1801_p1 = scmp.eq.s32.totalorder (!%p1800_p13), %s1448_s28, 0 }
  0x2b   : > { %252 = sbr.rel (%p1800_p13) target bundleno = 1384 (0x568), region = 48 }
  0x32   : > { %1344 = dma.done.wait (%p1801_p1), [#allocation3], 64   ;;  %p1802_p0 = pmov %p1801_p1 }
  0x33   : > { %p283_p6 = scmp.lt.s32.totalorder %s1448_s28, 1  ;;  %s1368_s13 = smov 1   ;;  %vm346_vm0 = vcmask 121856   ;;  %vm301_vm1 = vcmask 7168   ;;  %v1373_v57 = vmov 0.0|0.0   ;;  %vm1374_vm2 = vmmov 0  }
  0x34   : > { %1346 = vsyncadd (%p1802_p0), [#allocation3], 4294967232  ;;  %s1369_s15 = smov 127   ;;  %s1370_s20 = smov 32   ;;  %1084 = vmatprep.subr.bf16.mxu1 %v1373_v57  ;;  %v1375_v59 = vmov 0.0   ;;  %v1376_v61 = vmov 0  }
  0x35   : > { %s284_s14 = scalar_select %p283_p6, %s1448_s28, 1  ;;  %1059 = vmatprep.mubr.msk.f32.mxu1 %vm1374_vm2, %v1375_v59  ;;  %1259 = vset.pattern.permute.xlu1 %v1376_v61  ;;  %v296_v63 = vld [vmem:[%s1787_s2] sm:$0xf]  ;;  %vm325_vm3 = vcmask 130048   ;;  %vm327_vm4 = vcmask 261120   ;;  %vm329_vm5 = vcmask 392192  }
  0x36   : > { %s1371_s21 = smov 16   ;;  %s1372_s22 = smov 48   ;;  %1270 = vset.pattern.permute.xlu0 %v1376_v61  ;;  %vm517_vm6 = vcmask 1040384   ;;  %vm519_vm7 = vcmask 1041408   ;;  %vm521_vm8 = vcmask 1042432   ;;  %vm523_vm9 = vcmask 1043456  }
  0x37   : > { %s1027_s17 = sshll.u32 %s284_s14, 3  ;;  %vm525_vm10 = vcmask 1044480   ;;  %vm527_vm11 = vcmask 1045504   ;;  %vm529_vm12 = vcmask 1046528   ;;  %vm1377_vm13 = vmmov 1   ;;  %s1378_s8 = smov 111  }
  0x38   : > { %s286_s19 = scalar_lea.vmem %s1785_s0, %s1027_s17  ;;  %vm1086_vm14 = vmpackc.low %vm517_vm6, %vm1377_vm13  ;;  %vm536_vm15 = vcmask 72704   ;;  %s1379_s9 = smov 95  }
  0x39   : > { %v1515_v0 = vld [vmem:[%s286_s19 + $0x3] sm:$0x1]  ;;  %v1517_v1 = vld [vmem:[%s286_s19 + $0x4] sm:$0x1]  ;;  %v1519_v2 = vld [vmem:[%s286_s19 + $0x1] sm:$0x1] }
  0x3a   : > { %v1179_v3 = vpack.i.bf16 %v1517_v1, %v1515_v0  ;;  %v1169_v4 = vpack.i.bf16 %v1515_v0, %v1519_v2  ;;  %v1525_v5 = vld [vmem:[%s286_s19 + $0x2] sm:$0x1]  ;;  %v1527_v6 = vld [vmem:[%s286_s19 + $0x5] sm:$0x1]  ;;  %v1535_v9 = vld [vmem:[%s286_s19 + $0x6] sm:$0x1] }
  0x3b   : > { %v1184_v7 = vpack.i.bf16 %v1525_v5, %v1527_v6  ;;  %v1174_v8 = vpack.i.bf16 %v1525_v5, %v1519_v2  ;;  %v1194_v10 = vpack.i.bf16 %v1535_v9, %v1517_v1  ;;  %v1189_v11 = vpack.i.bf16 %v1535_v9, %v1527_v6  ;;  %v1545_v12 = vld [vmem:[%s286_s19 + $0x7] sm:$0x1]  ;;  %v1551_v13 = vld [vmem:[%s286_s19] sm:$0x1]  ;;  %s1380_s14 = smov 113   ;;  %s1381_s17 = smov 81  }
  0x3c   : > { %1180 = vrot.lane.b32.xlu1 %v1179_v3, %s1368_s13  ;;  %1170 = vrot.lane.b32.xlu0 %v1169_v4, %s1369_s15  ;;  %s1382_s18 = smov 79   ;;  %s1383_s16 = smov 97  }
  0x3d   : > { %s1384_s19 = smov 112   ;;  %p1803_p9 = scmp.ne.s32.totalorder %s1796_s11, 0 }
  0x40   : > { %1185 = vrot.lane.b32.xlu1 %v1184_v7, %s1369_s15  ;;  %1175 = vrot.lane.b32.xlu0 %v1174_v8, %s1368_s13 }
  0x44   : > { %1195 = vrot.lane.b32.xlu1 %v1194_v10, %s1369_s15  ;;  %1190 = vrot.lane.b32.xlu0 %v1189_v11, %s1368_s13 }
  0x48   : > { %450 = vrot.lane.b32.xlu0 %v1545_v12, %s1368_s13  ;;  %479 = vrot.lane.b32.xlu1 %v1545_v12, %s1369_s15 }
  0x4c   : > { %418 = vrot.lane.b32.xlu1 %v1551_v13, %s1369_s15  ;;  %372 = vrot.lane.b32.xlu0 %v1551_v13, %s1368_s13 }
  0xae   : > { %v1181_v14 = vpop.permute.xlu1 %1180  ;;  %v1171_v15 = vpop.permute.xlu0 %1170 }
  0xaf   : > { %v1173_v16 = vunpack.i.h.bf16 %v1171_v15  ;;  %v1172_v17 = vunpack.i.l.bf16 %v1171_v15  ;;  %v1183_v20 = vunpack.i.h.bf16 %v1181_v14  ;;  %v1182_v21 = vunpack.i.l.bf16 %v1181_v14 }
  0xb1   : > { %v1558_v18 = vsel %vm346_vm0, %v1173_v16, 0.0  ;;  %v1561_v19 = vsel %vm346_vm0, %v1172_v17, 0.0  ;;  %v385_v33 = vsel %vm301_vm1, 0.0, %v1183_v20  ;;  %v307_v34 = vsel %vm301_vm1, 0.0, %v1182_v21 }
  0xb2   : > { %v1186_v22 = vpop.permute.xlu1 %1185  ;;  %v1176_v23 = vpop.permute.xlu0 %1175  ;;  %v1204_v24 = vpack.i.bf16 %v1558_v18, %v1515_v0  ;;  %v1199_v25 = vpack.i.bf16 %v1561_v19, %v1519_v2  ;;  %v1219_v46 = vpack.i.bf16 %v385_v33, %v307_v34  ;;  %v1244_v54 = vpack.i.bf16 %v1515_v0, %v307_v34 }
  0xb3   : > { %v1188_v26 = vunpack.i.h.bf16 %v1186_v22  ;;  %v1187_v27 = vunpack.i.l.bf16 %v1186_v22  ;;  %v1178_v28 = vunpack.i.h.bf16 %v1176_v23  ;;  %v1177_v29 = vunpack.i.l.bf16 %v1176_v23 }
  0xb4   : > { %1205 = vrot.lane.b32.xlu1 %v1204_v24, %s1370_s20  ;;  %1200 = vrot.lane.b32.xlu0 %v1199_v25, %s1371_s21 }
  0xb5   : > { %v355_v30 = vsel %vm346_vm0, %v1187_v27, 0.0  ;;  %v380_v31 = vsel %vm301_vm1, 0.0, %v1178_v28  ;;  %v1572_v32 = vsel %vm301_vm1, 0.0, %v1177_v29  ;;  %v425_v39 = vsel %vm346_vm0, %v1188_v26, 0.0 }
  0xb6   : > { %v1209_v35 = vpack.i.bf16 %v380_v31, %v1572_v32  ;;  %v1214_v36 = vpack.i.bf16 %v355_v30, %v1527_v6  ;;  %v1196_v37 = vpop.permute.xlu1 %1195  ;;  %v1191_v38 = vpop.permute.xlu0 %1190  ;;  %v1224_v47 = vpack.i.bf16 %v425_v39, %v1525_v5 }
  0xb7   : > { %v1197_v40 = vunpack.i.l.bf16 %v1196_v37  ;;  %v1193_v41 = vunpack.i.h.bf16 %v1191_v38  ;;  %v1192_v42 = vunpack.i.l.bf16 %v1191_v38  ;;  %v1198_v48 = vunpack.i.h.bf16 %v1196_v37 }
  0xb8   : > { %1210 = vrot.lane.b32.xlu1 %v1209_v35, %s1371_s21  ;;  %1215 = vrot.lane.b32.xlu0 %v1214_v36, %s1372_s22 }
  0xb9   : > { %v429_v43 = vsel %vm346_vm0, %v1197_v40, 0.0  ;;  %v390_v44 = vsel %vm301_vm1, 0.0, %v1193_v41  ;;  %v312_v45 = vsel %vm301_vm1, 0.0, %v1192_v42  ;;  %v433_v52 = vsel %vm346_vm0, %v1198_v48, 0.0 }
  0xba   : > { %v1234_v49 = vpack.i.bf16 %v429_v43, %v1517_v1  ;;  %v1229_v50 = vpack.i.bf16 %v390_v44, %v312_v45  ;;  %v451_v51 = vpop.permute.xlu0 %450  ;;  %v1239_v55 = vpack.i.bf16 %v433_v52, %v1535_v9  ;;  %v1249_v58 = vpack.i.bf16 %v1527_v6, %v312_v45  ;;  %v480_v60 = vpop.permute.xlu1 %479 }
  0xbb   : > { %v453_v53 = vsel %vm301_vm1, 0.0, %v451_v51  ;;  %v482_v62 = vsel %vm346_vm0, %v480_v60, 0.0 }
  0xbc   : > { %1220 = vrot.lane.b32.xlu1 %v1219_v46, %s1370_s20  ;;  %1225 = vrot.lane.b32.xlu0 %v1224_v47, %s1371_s21  ;;  %v1254_v56 = vpack.i.bf16 %v1545_v12, %v453_v53 }
  0xbe   : > { %v419_v0 = vpop.permute.xlu1 %418  ;;  %v373_v1 = vpop.permute.xlu0 %372 }
  0xbf   : > { %v375_v24 = vsel %vm301_vm1, 0.0, %v373_v1  ;;  %v421_v44 = vsel %vm346_vm0, %v419_v0, 0.0 }
  0xc0   : > { %1235 = vrot.lane.b32.xlu1 %v1234_v49, %s1370_s20  ;;  %1230 = vrot.lane.b32.xlu0 %v1229_v50, %s1372_s22 }
  0xc4   : > { %1245 = vrot.lane.b32.xlu1 %v1244_v54, %s1371_s21  ;;  %1240 = vrot.lane.b32.xlu0 %v1239_v55, %s1372_s22 }
  0xc8   : > { %1255 = vrot.lane.b32.xlu1 %v1254_v56, %s1372_s22  ;;  %1250 = vrot.lane.b32.xlu0 %v1249_v58, %s1370_s20 }
  0xcc   : > { %486 = vrot.lane.b32.xlu1 %v355_v30, %s1370_s20  ;;  %483 = vrot.lane.b32.xlu0 %v1558_v18, %s1371_s21  ;;  %s1385_s20 = smov 96  }
  0xd0   : > { %490 = vrot.lane.b32.xlu0 %v482_v62, %s1372_s22  ;;  %533 = vperm.xlu1 %1259, %v296_v63   ;;  %s1038_s22 = sshll.u32 %s1448_s28, 7  ;;  %s1386_s28 = smov [#allocation5]  }
 0x126   : > { %v1206_v3 = vpop.permute.xlu1 %1205  ;;  %v1201_v4 = vpop.permute.xlu0 %1200 }
 0x127   : > { %v1202_v5 = vunpack.i.l.bf16 %v1201_v4  ;;  %v1203_v6 = vunpack.i.h.bf16 %v1201_v4  ;;  %v1207_v9 = vunpack.i.l.bf16 %v1206_v3  ;;  %v1208_v10 = vunpack.i.h.bf16 %v1206_v3 }
 0x129   : > { %v340_v11 = vsel %vm325_vm3, 0.0, %v1202_v5  ;;  %v368_v15 = vsel %vm325_vm3, 0.0, %v1203_v6 }
 0x12a   : > { %v1211_v7 = vpop.permute.xlu1 %1210  ;;  %v1216_v8 = vpop.permute.xlu0 %1215  ;;  %v341_v21 = vsel %vm327_vm4, %v340_v11, %v1207_v9  ;;  %v369_v25 = vsel %vm327_vm4, %v368_v15, %v1208_v10 }
 0x12b   : > { %v1212_v12 = vunpack.i.l.bf16 %v1211_v7  ;;  %v1217_v14 = vunpack.i.l.bf16 %v1216_v8  ;;  %v1213_v16 = vunpack.i.h.bf16 %v1211_v7  ;;  %v1218_v17 = vunpack.i.h.bf16 %v1216_v8 }
 0x12d   : > { %v326_v26 = vsel %vm325_vm3, 0.0, %v1212_v12  ;;  %v342_v27 = vsel %vm329_vm5, %v341_v21, %v1217_v14  ;;  %v403_v28 = vsel %vm325_vm3, %v375_v24, %v1213_v16  ;;  %v370_v29 = vsel %vm329_vm5, %v369_v25, %v1218_v17 }
 0x12e   : > { %v1221_v18 = vpop.permute.xlu1 %1220  ;;  %v1226_v20 = vpop.permute.xlu0 %1225  ;;  %v497_v38 = vrot.slane %v342_v27, 7  ;;  %v500_v45 = vrot.slane %v370_v29, 6  ;;  %v295_v27 = vld [vmem:[#allocation2] sm:$0xf] }
 0x12f   : > { %v1223_v22 = vunpack.i.h.bf16 %v1221_v18  ;;  %v1222_v23 = vunpack.i.l.bf16 %v1221_v18  ;;  %v1227_v30 = vunpack.i.l.bf16 %v1226_v20  ;;  %v1228_v34 = vunpack.i.h.bf16 %v1226_v20 }
 0x131   : > { %v328_v39 = vsel %vm327_vm4, %v326_v26, %v1222_v23  ;;  %v404_v40 = vsel %vm327_vm4, %v403_v28, %v1223_v22  ;;  %v415_v46 = vsel %vm325_vm3, %v1551_v13, %v1227_v30  ;;  %v446_v50 = vsel %vm325_vm3, %v421_v44, %v1228_v34 }
 0x132   : > { %v1236_v31 = vpop.permute.xlu1 %1235  ;;  %v1231_v33 = vpop.permute.xlu0 %1230 }
 0x133   : > { %v1237_v35 = vunpack.i.l.bf16 %v1236_v31  ;;  %v1233_v36 = vunpack.i.h.bf16 %v1231_v33  ;;  %v1232_v37 = vunpack.i.l.bf16 %v1231_v33  ;;  %v1238_v41 = vunpack.i.h.bf16 %v1236_v31 }
 0x135   : > { %v405_v42 = vsel %vm329_vm5, %v404_v40, %v1233_v36  ;;  %v330_v43 = vsel %vm329_vm5, %v328_v39, %v1232_v37  ;;  %v416_v51 = vsel %vm327_vm4, %v415_v46, %v1237_v35  ;;  %v447_v54 = vsel %vm327_vm4, %v446_v50, %v1238_v41 }
 0x136   : > { %v1246_v47 = vpop.permute.xlu1 %1245  ;;  %v1241_v48 = vpop.permute.xlu0 %1240  ;;  %v518_v49 = vsel %vm517_vm6, %v330_v43, %v497_v38  ;;  %v503_v55 = vrot.slane %v405_v42, 5 }
 0x137   : > { %v1243_v52 = vunpack.i.h.bf16 %v1241_v48  ;;  %v1242_v53 = vunpack.i.l.bf16 %v1241_v48  ;;  %v1248_v56 = vunpack.i.h.bf16 %v1246_v47  ;;  %v1247_v58 = vunpack.i.l.bf16 %v1246_v47  ;;  %v619_v48 = vld [vmem:[%s1789_s4] sm:$0xff] }
 0x138   : > { %v520_v13 = vsel %vm519_vm7, %v518_v49, %v500_v45 }
 0x139   : > { %v417_v60 = vsel %vm329_vm5, %v416_v51, %v1242_v53  ;;  %v448_v61 = vsel %vm329_vm5, %v447_v54, %v1243_v52  ;;  %v476_v6 = vsel %vm325_vm3, %v1519_v2, %v1248_v56  ;;  %v464_v7 = vsel %vm325_vm3, %v1572_v32, %v1247_v58 }
 0x13a   : > { %v506_v62 = vrot.slane %v417_v60, 4  ;;  %v1256_v63 = vpop.permute.xlu1 %1255  ;;  %v1251_v0 = vpop.permute.xlu0 %1250  ;;  %v509_v8 = vrot.slane %v448_v61, 3  ;;  %v522_v9 = vsel %vm521_vm8, %v520_v13, %v503_v55 }
 0x13b   : > { %v1258_v1 = vunpack.i.h.bf16 %v1256_v63  ;;  %v1257_v3 = vunpack.i.l.bf16 %v1256_v63  ;;  %v1253_v4 = vunpack.i.h.bf16 %v1251_v0  ;;  %v1252_v5 = vunpack.i.l.bf16 %v1251_v0 }
 0x13c   : > { %v524_v12 = vsel %vm523_vm9, %v522_v9, %v506_v62 }
 0x13d   : > { %v477_v10 = vsel %vm327_vm4, %v476_v6, %v1253_v4  ;;  %v465_v11 = vsel %vm327_vm4, %v464_v7, %v1252_v5  ;;  %v526_v20 = vsel %vm525_vm10, %v524_v12, %v509_v8 }
 0x13e   : > { %v466_v14 = vsel %vm329_vm5, %v465_v11, %v1257_v3  ;;  %v484_v15 = vpop.permute.xlu0 %483  ;;  %v478_v16 = vsel %vm329_vm5, %v477_v10, %v1258_v1  ;;  %v487_v2 = vpop.permute.xlu1 %486 }
 0x13f   : > { %v512_v17 = vrot.slane %v466_v14, 2  ;;  %v493_v32 = vsel %vm325_vm3, %v1561_v19, %v484_v15  ;;  %v515_v18 = vrot.slane %v478_v16, 1 }
 0x140   : > { %v494_v22 = vsel %vm327_vm4, %v493_v32, %v487_v2  ;;  %vm847_vm4 = vcmask 293888  }
 0x141   : > { %v528_v21 = vsel %vm527_vm11, %v526_v20, %v512_v17 }
 0x142   : > { %v491_v23 = vpop.permute.xlu0 %490  ;;  %v530_v24 = vsel %vm529_vm12, %v528_v21, %v515_v18 }
 0x143   : > { %v495_v25 = vsel %vm329_vm5, %v494_v22, %v491_v23  ;;  %v618_v22 = vld [vmem:[%s1788_s3] sm:$0xff]  ;;  %vm1032_vm5 = vmneg %vm523_vm9 }
 0x144   : > { %v1085_v26 = vpack.c.bf16 %v495_v25, %v530_v24  ;;  %vm1092_vm6 = vmpackc.low %vm1032_vm5, %vm1377_vm13 }
 0x146   : > { %1087 = vmatpush3.bf16.msk.msra.mxu1 %vm1086_vm14, %v1085_v26 }
 0x147   : > { %1088 = vmatprep.subr.bf16.mxu1 %v1373_v57 }
 0x149   : > { %1060 = vmatmul.mubr.msk.f32.vlgmr.msra.gmra.mrb[0].mxu1 %vm536_vm15, %v295_v27 }
 0x14a   : > { %1068 = vmatprep.mubr.msk.f32.mxu1 %vm1374_vm2, %v1375_v59  ;;  %vm721_vm2 = vcmask 146432  }
 0x14f   : > { %v534_v19 = vpop.permute.xlu1 %533 }
 0x21c   : > { %v609_v28 = vpop.f32.mrb[0].mxu1 }
 0x21d   : > { %v610_v29 = vadd.f32 %v609_v28, %v534_v19  ;;  %v1061_v30 = vpop.f32.mrb[1].mxu1 }
 0x21e   : > { %v803_v30 = vld [vmem:[%s1790_s5] sm:$0xff] }
 0x21f   : > { %v613_v31 = vmax.f32 %v610_v29, 0.0  ;;  %v615_v33 = vrot.slane %v610_v29, 2  ;;  %1081 = vmatprep.mubr.msk.f32.mxu0 %vm847_vm4, %v803_v30 }
 0x221   : > { %v1653_v34 = vadd.f32 %v615_v33, %v613_v31  ;;  %v806_v31 = vld [vmem:[%s1791_s6 + $0x8] sm:$0xff] }
 0x223   : > { %631 = vrot.lane.b32.xlu1 %v1653_v34, %s1378_s8  ;;  %661 = vrot.lane.b32.xlu0 %v1653_v34, %s1379_s9  ;;  %v630_v54 = vsel %vm325_vm3, 0.0, %v1653_v34 }
 0x224   : > { %v693_v63 = vrot.slane %v630_v54, 6 }
 0x227   : > { %621 = vrot.lane.b32.xlu1 %v1653_v34, %s1380_s14  ;;  %670 = vrot.lane.b32.xlu0 %v1653_v34, %s1381_s17  ;;  %s1742_s17 = scalar_lea.hbm %s1792_s7, %s1038_s22 }
 0x22b   : > { %683 = vrot.lane.b32.xlu1 %v1653_v34, %s1382_s18  ;;  %644 = vrot.lane.b32.xlu0 %v1653_v34, %s1383_s16 }
 0x22f   : > { %657 = vrot.lane.b32.xlu0 %v1653_v34, %s1369_s15 }
 0x233   : > { %640 = vrot.lane.b32.xlu0 %v1653_v34, %s1368_s13 }
 0x295   : > { %v632_v57 = vpop.permute.xlu1 %631  ;;  %v662_v35 = vpop.permute.xlu0 %661 }
 0x296   : > { %v634_v36 = vsel %vm346_vm0, %v632_v57, 0.0  ;;  %v664_v37 = vsel %vm346_vm0, %v662_v35, 0.0 }
 0x297   : > { %v1260_v38 = vpack.i.bf16 %v634_v36, %v664_v37 }
 0x299   : > { %v622_v39 = vpop.permute.xlu1 %621  ;;  %1261 = vrot.lane.b32.xlu1 %v1260_v38, %s1371_s21  ;;  %v671_v40 = vpop.permute.xlu0 %670 }
 0x29a   : > { %v624_v41 = vsel %vm301_vm1, 0.0, %v622_v39  ;;  %v673_v42 = vsel %vm301_vm1, 0.0, %v671_v40 }
 0x29b   : > { %v1265_v43 = vpack.i.bf16 %v624_v41, %v673_v42 }
 0x29d   : > { %1266 = vrot.lane.b32.xlu1 %v1265_v43, %s1371_s21  ;;  %v645_v44 = vpop.permute.xlu0 %644  ;;  %v684_v46 = vpop.permute.xlu1 %683 }
 0x29e   : > { %v647_v45 = vsel %vm301_vm1, 0.0, %v645_v44  ;;  %v686_v47 = vsel %vm346_vm0, %v684_v46, 0.0 }
 0x29f   : > { %649 = vrot.lane.b32.xlu0 %v647_v45, %s1371_s21 }
 0x2a1   : > { %653 = vrot.lane.b32.xlu1 %v1653_v34, %s1384_s19  ;;  %v658_v49 = vpop.permute.xlu0 %657 }
 0x2a2   : > { %v660_v55 = vsel %vm346_vm0, %v658_v49, 0.0 }
 0x2a3   : > { %679 = vrot.lane.b32.xlu0 %v1653_v34, %s1385_s20 }
 0x2a5   : > { %688 = vrot.lane.b32.xlu1 %v686_v47, %s1371_s21  ;;  %v641_v52 = vpop.permute.xlu0 %640 }
 0x2a6   : > { %v643_v13 = vsel %vm301_vm1, 0.0, %v641_v52 }
 0x2a7   : > { %718 = vperm.xlu0 %1270, %v619_v48  }
 0x30b   : > { %v1262_v50 = vpop.permute.xlu1 %1261 }
 0x30c   : > { %v1263_v51 = vunpack.i.l.bf16 %v1262_v50  ;;  %v1264_v53 = vunpack.i.h.bf16 %v1262_v50 }
 0x30e   : > { %v669_v58 = vsel %vm325_vm3, %v660_v55, %v1263_v51  ;;  %v639_v62 = vsel %vm325_vm3, 0.0, %v1264_v53 }
 0x30f   : > { %v1267_v56 = vpop.permute.xlu1 %1266  ;;  %v702_v5 = vrot.slane %v669_v58, 6  ;;  %v696_v8 = vrot.slane %v639_v62, 4 }
 0x310   : > { %v1269_v60 = vunpack.i.h.bf16 %v1267_v56  ;;  %v1268_v61 = vunpack.i.l.bf16 %v1267_v56 }
 0x311   : > { %v650_v0 = vpop.permute.xlu0 %649 }
 0x312   : > { %v629_v1 = vsel %vm325_vm3, 0.0, %v1269_v60  ;;  %v678_v3 = vsel %vm325_vm3, %v624_v41, %v1268_v61  ;;  %v652_v4 = vsel %vm325_vm3, %v643_v13, %v650_v0 }
 0x313   : > { %v710_v6 = vsel %vm519_vm7, %v629_v1, %v693_v63  ;;  %v654_v7 = vpop.permute.xlu1 %653  ;;  %v705_v9 = vrot.slane %v678_v3, 4  ;;  %v699_v11 = vrot.slane %v652_v4, 2 }
 0x314   : > { %v656_v10 = vsel %vm325_vm3, %v1653_v34, %v654_v7  ;;  %v711_v15 = vsel %vm523_vm9, %v710_v6, %v696_v8  ;;  %v805_v34 = vld [vmem:[%s1791_s6] sm:$0xff] }
 0x315   : > { %v713_v12 = vsel %vm519_vm7, %v656_v10, %v702_v5  ;;  %v680_v14 = vpop.permute.xlu0 %679  ;;  %v712_v32 = vsel %vm527_vm11, %v711_v15, %v699_v11 }
 0x316   : > { %v682_v16 = vsel %vm325_vm3, %v654_v7, %v680_v14  ;;  %v714_v2 = vsel %vm523_vm9, %v713_v12, %v705_v9 }
 0x317   : > { %v708_v17 = vrot.slane %v682_v16, 2  ;;  %v689_v21 = vpop.permute.xlu1 %688 }
 0x318   : > { %v691_v23 = vsel %vm325_vm3, %v634_v36, %v689_v21 }
 0x319   : > { %v715_v18 = vsel %vm527_vm11, %v714_v2, %v708_v17 }
 0x31a   : > { %v1089_v20 = vpack.c.bf16 %v715_v18, %v712_v32 }
 0x31c   : > { %1090 = vmatpush3.bf16.msra.mxu1 %v1089_v20 }
 0x31d   : > { %1066 = vmatprep.subr.mxu1 %v1375_v59 }
 0x320   : > { %1067 = vmatpush3.msk.msra.mxu1 %vm519_vm7, %v691_v23 }
 0x321   : > { %1069 = vmatmul.mubr.msk.f32.vlgmr.msra.gmra.mrb[2].mxu1 %vm721_vm2, %v618_v22 }
 0x326   : > { %v719_v24 = vpop.permute.xlu0 %718 }
 0x3f4   : > { %v794_v25 = vpop.f32.mrb[2].mxu1 }
 0x3f5   : > { %v795_v26 = vadd.f32 %v794_v25, %v719_v24  ;;  %v1070_v27 = vpop.f32.mrb[3].mxu1 }
 0x3f7   : > { %v798_v19 = vmax.f32 %v795_v26, 0.0  ;;  %v800_v28 = vrot.slane %v795_v26, 4 }
 0x3f9   : > { %v802_v29 = vadd.f32 %v800_v28, %v798_v19 }
 0x3fb   : > { %816 = vrot.lane.b32.xlu0 %v802_v29, %s1380_s14  ;;  %808 = vrot.lane.b32.xlu1 %v802_v29, %s1368_s13  ;;  %v830_v33 = vrot.slane %v802_v29, 4  ;;  %s1303_s13 = sshll.u32 %s1386_s28, 4  ;;  %s1304_s13 = int_to_ptr.vmem [resolvable:$false] %s1303_s13 }
 0x3fc   : > { %s1305_s14 = scalar_lea.vmem %s1304_s13, 256 }
 0x3ff   : > { %820 = vrot.lane.b32.xlu0 %v802_v29, %s1378_s8  ;;  %812 = vrot.lane.b32.xlu1 %v802_v29, %s1369_s15 }
 0x403   : > { %844 = vperm.xlu0 %1270, %v806_v31   ;;  %831 = vrot.lane.b32.xlu1 %v830_v33, %s1384_s19  ;;  %s280_s19 = sand.u32 1, %s1357_s25  }
 0x404   : > { %s1026_s20 = sshll.u32 %s280_s19, 3  ;;  %s936_s18 = scalar_lea.sflag [#allocation4], %s280_s19 }
 0x405   : > { %s282_s23 = scalar_lea.vmem [#allocation5], %s1026_s20 }
 0x406   : > { %s949_s21 = sshll.u32 %s282_s23, 4  ;;  %s1744_s21 = int_to_ptr.vmem [resolvable:$true] %s949_s21 }
 0x407   : > { %839 = vperm.xlu1 %1259, %v805_v34   ;;  %s1299_s16 = scalar_lea.vmem %s1744_s21, 128  ;;  %p1306_p2 = scmp.lt.s32.totalorder %s1744_s21, %s1304_s13 }
 0x408   : > { %p1300_p5 = scmp.ne.s32.totalorder %s1744_s21, %s1299_s16  ;;  %p1307_p3 = scmp.lt.s32.totalorder %s1305_s14, %s1299_s16 }
 0x40a   : > { %p1301_p10 = pnand %p1300_p5, %p1803_p9  ;;  %p1308_p4 = por %p1307_p3, %p1306_p2 }
 0x40c   : > { %p1302_p12 = pneg %p1301_p10 }
 0x40e   : > { %p1309_p7 = pnand %p1308_p4, %p1302_p12 }
 0x46d   : > { %v809_v57 = vpop.permute.xlu1 %808  ;;  %v817_v37 = vpop.permute.xlu0 %816 }
 0x46e   : > { %v811_v35 = vsel %vm301_vm1, 0.0, %v809_v57  ;;  %v819_v42 = vsel %vm301_vm1, 0.0, %v817_v37 }
 0x46f   : > { %v825_v36 = vrot.slane %v811_v35, 4 }
 0x471   : > { %v813_v38 = vpop.permute.xlu1 %812  ;;  %v1091_v39 = vpack.c.bf16 %v825_v36, %v1375_v59  ;;  %v821_v46 = vpop.permute.xlu0 %820  ;;  %v804_v59 = vld [vmem:[%s1790_s5 + $0x8] sm:$0xff] }
 0x472   : > { %v815_v40 = vsel %vm346_vm0, %v813_v38, 0.0  ;;  %v823_v48 = vsel %vm346_vm0, %v821_v46, 0.0 }
 0x473   : > { %v828_v41 = vrot.slane %v815_v40, 4  ;;  %1093 = vmatprep.subr.msk.bf16.mxu0 %vm1092_vm6, %v1091_v39 }
 0x474   : > { %1096 = vmatpush3.bf16.msk.msra.mxu0 %vm1092_vm6, %v1091_v39 }
 0x475   : > { %v835_v43 = vsel %vm523_vm9, %v802_v29, %v828_v41  ;;  %v832_v44 = vpop.permute.xlu1 %831 }
 0x476   : > { %v836_v45 = vsel %vm523_vm9, %v819_v42, %v832_v44 }
 0x477   : > { %v1097_v47 = vpack.c.bf16 %v836_v45, %v835_v43 }
 0x479   : > { %1098 = vmatprep.subr.bf16.mxu0 %v1097_v47 }
 0x47a   : > { %1100 = vmatpush3.bf16.msra.mxu0 %v1097_v47 }
 0x47b   : > { %1079 = vmatprep.subr.msk.mxu0 %vm523_vm9, %v823_v48 }
 0x47e   : > { %1080 = vmatpush3.msk.msra.mxu0 %vm523_vm9, %v823_v48 }
 0x47f   : > { %1082 = vmatmul.mubr.msk.f32.vlgmr.msra.gmra.mrb[0].mxu0 %vm847_vm4, %v804_v59 }
 0x482   : > { %v845_v53 = vpop.permute.xlu0 %844 }
 0x486   : > { %v840_v50 = vpop.permute.xlu1 %839 }
 0x552   : > { %v1083_v49 = vpop.f32.mrb[0].mxu0 }
 0x553   : > { %v923_v51 = vpop.f32.mrb[1].mxu0  ;;  %v929_v54 = vadd.f32 %v1083_v49, %v845_v53 }
 0x554   : > { %v924_v52 = vadd.f32 %v923_v51, %v840_v50 }
 0x556   : > { %v932_v55 = vmax.f32 %v924_v52, 0.0 }
 0x558   : > { %v933_v56 = vadd.f32 %v932_v55, %v929_v54 }
 0x55a   : > { %934 = vst.msk [vmem:[%s282_s23] sm:$0xff] %vm325_vm3, %v933_v56 }
 0x55b   : > { %1312 = shalt.err (!%p1309_p7)
}
 0x55c   : > { %s1313_s15 = scalar_lea.hbm %s1742_s17, 128  ;;  %s1317_s20 = scalar_lea.hbm %s1792_s7, 256 }
 0x55d   : > { %p1314_p8 = scmp.ne.s32.totalorder %s1742_s17, %s1313_s15  ;;  %p1318_p1 = scmp.lt.u32.totalorder %s1742_s17, %s1792_s7 }
 0x55e   : > { %p1319_p0 = scmp.lt.u32.totalorder %s1317_s20, %s1313_s15  ;;  %p1321_p5 = scmp.lt.u32.totalorder %s1313_s15, %s1742_s17 }
 0x55f   : > { %p1315_p11 = pnand %p1314_p8, %p1803_p9 }
 0x560   : > { %p1320_p6 = por %p1319_p0, %p1318_p1 }
 0x561   : > { %p1316_p13 = pneg %p1315_p11 }
 0x562   : > { %p1322_p10 = por %p1321_p5, %p1320_p6 }
 0x564   : > { %p1323_p12 = pnand %p1322_p10, %p1316_p13 }
 0x566   : > { %1326 = shalt.err (!%p1323_p12)
}
 0x567   : > { %1105 = dma.vmem_to_hbm [thread:$0]  (%p1803_p9), %s1744_s21, 128, %s1742_s17, %s936_s18  }
 0x568 PF: > { %p1117_p2 = scmp.ge.s32.totalorder %s1365_s27, 2  ;;  %s961_s29 = sand.u32 1, %s1353_s24  }
 0x569   : > { %p1804_p3 = scmp.ne.s32.totalorder %s1797_s12, 0  ;;  %s962_s9 = scalar_lea.sflag [#allocation4], %s961_s29 }
 0x56b   : > { %p1112_p4 = pnand %p1117_p2, %p1804_p3 }
 0x56d   : > { %1348 = dma.done.wait (!%p1112_p4), %s962_s9, 128  }
 0x56e   : > { %1350 = vsyncadd (!%p1112_p4), %s962_s9, 4294967168  ;;  %p18_p7 = scmp.ge.s32.totalorder %s1452_s30, 4   ;;  %s1805_s24 = smov %s1357_s25 }
 0x56f   : > { %s1806_s25 = smov %s1361_s26  ;;  %s1807_s26 = smov %s1463_s10 }
 0x570   : > { %s1808_s27 = smov %s1452_s30  ;;  %20 = sbr.rel (!%p18_p7) target bundleno = 4 (0x4), region = 88 }
 0x577   :  { %967 = vsyncpa [#allocation3], 1 }
 0x578   :  { %969 = vsyncpa [#allocation3 + $0x1], 1 }
 0x579   :  { %970 = vsyncpa [#allocation4], 1 }
 0x57a   :  { %972 = vsyncpa [#allocation4 + $0x1], 1 }

</bundles_post_ra>
